<compile_context>
chip_gen: v5e
topology: v5e:2x2
jax: 0.10.0
libtpu: 0.0.40
codegen_flags: <defaults>
</compile_context>

<pallas_src>
import functools

import jax
import jax.numpy as jnp
from jax.experimental import pallas as pl
from jax.experimental.pallas import tpu as pltpu


def _round_up(x, m):
    return -(-x // m) * m


def conv_relu_kernel(x_ref, w_ref, b_ref, o_ref, *, tap_starts):
    """Dense (stride-1) conv + bias + ReLU for one (image, Cout-tile) pair.

    x_ref: (M_in, K)        flattened padded image rows
                            (K = Cin_p, or KW*Cin_p when KW is folded)
    w_ref: (n_taps, K, TCo) weight taps for this Cout tile
    b_ref: (1, TCo)         f32 bias for this Cout tile
    o_ref: (M_slab, TCo)    output row slab (row cols >= OW are junk, dropped
                            by the wrapper)
    """
    m_out = o_ref.shape[0]
    bias = b_ref[...].astype(jnp.float32)            # (1, TCo) broadcast
    acc = None
    # tap_starts is static -> unrolled at trace time; each tap is a contiguous
    # ref slice (no copy of the whole input) feeding one MXU matmul.
    for t, start in enumerate(tap_starts):
        lhs = x_ref[pl.ds(start, m_out), :]
        rhs = w_ref[t]
        d = jnp.dot(lhs, rhs, preferred_element_type=jnp.float32)
        # Fold the bias into the first tap: no zero-init pass and no separate
        # full-slab bias add pass.
        acc = d + bias if acc is None else acc + d
    o_ref[...] = jnp.maximum(acc, 0.0).astype(o_ref.dtype)


def _vmem_bytes(rows, cols, itemsize):
    pack = 32 // itemsize                 # sublane packing: 8 f32 / 16 bf16
    return _round_up(rows, pack) * _round_up(cols, 128) * itemsize


@functools.partial(
    jax.jit, static_argnames=("stride", "padding", "use_bf16", "out_dtype"))
def basic_conv(x_nchw, w_hwio, bias, *, stride=1, padding=0,
               use_bf16=True, out_dtype=None):
    """Forward pass of BasicConv: Conv2d(stride, padding) + ReLU (NCHW in/out)."""
    N, Cin, H, W = x_nchw.shape
    KH, KW, Cin_w, Cout = w_hwio.shape
    assert Cin_w == Cin, (Cin_w, Cin)
    assert stride >= 1

    Hp, Wp = H + 2 * padding, W + 2 * padding
    if Hp < KH or Wp < KW:
        raise ValueError("basic_conv: kernel larger than padded input")
    OHf, OWf = Hp - KH + 1, Wp - KW + 1               # dense (stride-1) extent
    OH = (Hp - KH) // stride + 1
    OW = (Wp - KW) // stride + 1

    in_dtype = x_nchw.dtype
    compute_dtype = jnp.bfloat16 if use_bf16 else in_dtype
    final_dtype = in_dtype if out_dtype is None else jnp.dtype(out_dtype)
    itemsize = jnp.dtype(compute_dtype).itemsize

    # Channel padding for dense lanes / saner contraction depth.
    Cin_p = _round_up(Cin, 8)
    # 256-wide Cout tiles fill the v6e/v7x MXU result width; 128 otherwise.
    TCo = 256 if _round_up(Cout, 128) >= 256 else 128
    Cout_p = _round_up(Cout, TCo)
    nco = Cout_p // TCo

    # Fold the KW taps into the contraction dim when Cin is small: raises MXU
    # contraction depth KW-fold and cuts accumulator passes KW-fold at the cost
    # of KW x input HBM bytes (tiny exactly when Cin is small).
    fold_kw = (KW > 1) and (Cin_p < 128)

    # --- layout glue (outside the kernel) ---
    x = jnp.transpose(x_nchw, (0, 2, 3, 1))           # NCHW -> NHWC
    x = jnp.pad(x, ((0, 0), (padding, padding), (padding, padding),
                    (0, Cin_p - Cin)))
    x = x.astype(compute_dtype)

    M_slab = OHf * Wp                                 # rows computed per image
    if fold_kw:
        # x_fold[n, h, w, kw*Cin_p + c] = x[n, h, w+kw, c] (zeros past row end)
        shifted = [jnp.pad(x[:, :, kw:, :], ((0, 0), (0, 0), (0, kw), (0, 0)))
                   for kw in range(KW)]
        x2d = jnp.stack(shifted, axis=3).reshape(N, Hp * Wp, KW * Cin_p)
        Kdim = KW * Cin_p
        M_in = Hp * Wp
        n_taps = KH
        tap_starts = tuple(kh * Wp for kh in range(KH))
    else:
        x2d = x.reshape(N, Hp * Wp, Cin_p)
        # + KW-1 zero rows so the last tap's slice stays in bounds.
        x2d = jnp.pad(x2d, ((0, 0), (0, KW - 1), (0, 0)))
        Kdim = Cin_p
        M_in = Hp * Wp + (KW - 1)
        n_taps = KH * KW
        tap_starts = tuple(kh * Wp + kw for kh in range(KH) for kw in range(KW))
        # TODO(synk): per-tap start kh*Wp+kw may be sublane-unaligned for bf16;
        # if the Mosaic dump shows per-tap relayouts, pad Wp to a multiple of 16.

    w = jnp.pad(w_hwio, ((0, 0), (0, 0), (0, Cin_p - Cin), (0, Cout_p - Cout)))
    w2 = w.reshape(n_taps, Kdim, Cout_p).astype(compute_dtype)
    b2 = jnp.pad(bias, (0, Cout_p - Cout)).reshape(1, Cout_p).astype(jnp.float32)

    # --- VMEM budget (double-buffered tiles + f32 accumulator) ---
    vmem_limit = 40 << 20                             # v7x-safe (< 64 MiB phys)
    vmem_est = (2 * _vmem_bytes(M_in, Kdim, itemsize)
                + 2 * n_taps * _vmem_bytes(Kdim, TCo, itemsize)
                + 2 * _vmem_bytes(M_slab, TCo, itemsize)
                + _vmem_bytes(M_slab, TCo, 4))
    if vmem_est > vmem_limit:
        # TODO(synk): add an OH-strip grid axis with a KH-1-row halo fetch.
        raise NotImplementedError(
            f"basic_conv: estimated VMEM {vmem_est >> 20} MiB exceeds "
            f"{vmem_limit >> 20} MiB; feature map too large without spatial tiling")

    # --- grid order: keep the bigger operand resident across the inner axis ---
    x_slab_bytes = M_in * Kdim * itemsize
    w_tile_bytes = n_taps * Kdim * TCo * itemsize
    # Prefer batch-leading when N > 1 so megacore (v7x) shards over batch
    # (avoids both cores DMA-ing the same image slab), unless the weight tile
    # clearly dominates HBM traffic.
    weight_resident = w_tile_bytes > x_slab_bytes * (4 if N > 1 else 1)

    if weight_resident:
        grid = (nco, N)                               # n innermost: w resident
        x_map = lambda c, n: (n, 0, 0)
        w_map = lambda c, n: (0, 0, c)
        b_map = lambda c, n: (0, c)
        o_map = lambda c, n: (n, 0, c)
    else:
        grid = (N, nco)                               # c innermost: x resident
        x_map = lambda n, c: (n, 0, 0)
        w_map = lambda n, c: (0, 0, c)
        b_map = lambda n, c: (0, c)
        o_map = lambda n, c: (n, 0, c)

    flops = 2 * N * M_slab * n_taps * Kdim * Cout_p
    bytes_accessed = (N * x_slab_bytes
                      + n_taps * Kdim * Cout_p * itemsize
                      + Cout_p * 4
                      + N * M_slab * Cout_p * itemsize)
    cost = pl.CostEstimate(flops=flops, transcendentals=0,
                           bytes_accessed=bytes_accessed)

    kernel = functools.partial(conv_relu_kernel, tap_starts=tap_starts)

    out2d = pl.pallas_call(
        kernel,
        # bf16 output halves vst / writeback / epilogue bytes; final cast to the
        # caller's dtype is fused into the transpose below.
        out_shape=jax.ShapeDtypeStruct((N, M_slab, Cout_p), compute_dtype),
        grid=grid,
        in_specs=[
            pl.BlockSpec((None, M_in, Kdim), x_map),
            pl.BlockSpec((n_taps, Kdim, TCo), w_map),
            pl.BlockSpec((1, TCo), b_map),
        ],
        out_specs=pl.BlockSpec((None, M_slab, TCo), o_map),
        compiler_params=pltpu.CompilerParams(
            dimension_semantics=("parallel", "parallel"),
            vmem_limit_bytes=vmem_limit,
        ),
        cost_estimate=cost,
    )(x2d, w2, b2)

    # Drop junk columns (ow >= OWf), apply stride by subsampling, drop Cout
    # padding, and go back to NCHW in the caller's dtype.
    out = out2d.reshape(N, OHf, Wp, Cout_p)
    if stride > 1:
        out = out[:, ::stride, ::stride, :]
    out = out[:, :OH, :OW, :Cout]
    # TODO(synk): keep activations NHWC end-to-end when chaining layers.
    return jnp.transpose(out, (0, 3, 1, 2)).astype(final_dtype)


def init_basic_conv_params(key, in_channel, out_channel, kernel_size):
    """Deterministic init matching nn.Conv2d default (U(-k, k), k=1/sqrt(fan_in))."""
    kh = kw = kernel_size
    fan_in = in_channel * kh * kw
    bound = 1.0 / jnp.sqrt(jnp.float32(fan_in))
    k_w, k_b = jax.random.split(key)
    w = jax.random.uniform(k_w, (kh, kw, in_channel, out_channel),
                           jnp.float32, -bound, bound)       # HWIO
    b = jax.random.uniform(k_b, (out_channel,), jnp.float32, -bound, bound)
    return w, b


if __name__ == "__main__":
    key = jax.random.PRNGKey(0)
    k_x, k_p = jax.random.split(key)

    # Small shapes consistent with BasicConv(in_channel=4, out_channel=8, kernel_size=3)
    N, Cin, H, W = 2, 4, 16, 16
    Cout, K = 8, 3

    x = jax.random.normal(k_x, (N, Cin, H, W), jnp.float32)   # NCHW like PyTorch
    w, b = init_basic_conv_params(k_p, Cin, Cout, K)
    w_oihw = jnp.transpose(w, (3, 2, 0, 1))

    for stride, padding in ((1, 0), (1, 1), (2, 1)):
        out = jax.block_until_ready(
            basic_conv(x, w, b, stride=stride, padding=padding))

        # Reference: XLA conv with the same bf16-compute / f32-accumulate recipe.
        ref = jax.lax.conv_general_dilated(
            x.astype(jnp.bfloat16), w_oihw.astype(jnp.bfloat16),
            window_strides=(stride, stride),
            padding=[(padding, padding), (padding, padding)],
            dimension_numbers=("NCHW", "OIHW", "NCHW"),
            preferred_element_type=jnp.float32)
        ref = jnp.maximum(ref + b.reshape(1, Cout, 1, 1), 0.0)

        oh = (H + 2 * padding - K) // stride + 1
        assert out.shape == (N, Cout, oh, oh), (out.shape, stride, padding)
        assert out.dtype == x.dtype, out.dtype
        assert jnp.allclose(out.astype(jnp.float32), ref, atol=2e-2, rtol=2e-2), (
            f"mismatch vs reference conv (stride={stride}, padding={padding})")

    print("KERNEL_OK")
</pallas_src>

<mosaic_0001>
module attributes {stable_mosaic.version = 11 : i64} {
  func.func @conv_relu_kernel(%arg0: i32, %arg1: i32, %arg2: memref<1x256x24xbf16, #tpu.memory_space<vmem>>, %arg3: memref<3x24x128xbf16, #tpu.memory_space<vmem>>, %arg4: memref<1x128xf32, #tpu.memory_space<vmem>>, %arg5: memref<1x224x128xbf16, #tpu.memory_space<vmem>>) attributes {dimension_semantics = [#tpu.dimension_semantics<parallel>, #tpu.dimension_semantics<parallel>], iteration_bounds = array<i64: 2, 1>, scalar_prefetch = 0 : i64, scratch_operands = 0 : i64, tpu.core_type = #tpu.core_type<tc>, window_params = [{transform_indices = @transform_0, window_bounds = array<i64: 1, 256, 24>}, {transform_indices = @transform_1, window_bounds = array<i64: 3, 24, 128>}, {transform_indices = @transform_2, window_bounds = array<i64: 1, 128>}, {transform_indices = @transform_3, window_bounds = array<i64: 1, 224, 128>}]} {
    %c0 = arith.constant 0 : index
    %c0_0 = arith.constant 0 : index
    %0 = vector.load %arg4[%c0, %c0_0] : memref<1x128xf32, #tpu.memory_space<vmem>>, vector<1x128xf32>
    %c0_1 = arith.constant 0 : index
    %c0_2 = arith.constant 0 : index
    %c0_3 = arith.constant 0 : index
    %1 = vector.load %arg2[%c0_1, %c0_2, %c0_3] : memref<1x256x24xbf16, #tpu.memory_space<vmem>>, vector<1x224x24xbf16>
    %2 = vector.shape_cast %1 : vector<1x224x24xbf16> to vector<224x24xbf16>
    %c0_4 = arith.constant 0 : index
    %c0_5 = arith.constant 0 : index
    %c0_6 = arith.constant 0 : index
    %3 = vector.load %arg3[%c0_4, %c0_5, %c0_6] : memref<3x24x128xbf16, #tpu.memory_space<vmem>>, vector<1x24x128xbf16>
    %4 = vector.shape_cast %3 : vector<1x24x128xbf16> to vector<24x128xbf16>
    %cst = arith.constant dense<0.000000e+00> : vector<224x128xf32>
    %5 = tpu.matmul %2, %4, %cst {dimension_numbers = #tpu.dot_dimension_numbers<[1], [0], [0], [1], [0, 0, 1, 1], [], []>} : vector<224x24xbf16>, vector<24x128xbf16>, vector<224x128xf32> -> vector<224x128xf32>
    %6 = vector.broadcast %0 : vector<1x128xf32> to vector<224x128xf32>
    %7 = arith.addf %5, %6 : vector<224x128xf32>
    %c0_7 = arith.constant 0 : index
    %c16 = arith.constant 16 : index
    %c0_8 = arith.constant 0 : index
    %8 = vector.load %arg2[%c0_7, %c16, %c0_8] : memref<1x256x24xbf16, #tpu.memory_space<vmem>>, vector<1x224x24xbf16>
    %9 = vector.shape_cast %8 : vector<1x224x24xbf16> to vector<224x24xbf16>
    %c1 = arith.constant 1 : index
    %c0_9 = arith.constant 0 : index
    %c0_10 = arith.constant 0 : index
    %10 = vector.load %arg3[%c1, %c0_9, %c0_10] : memref<3x24x128xbf16, #tpu.memory_space<vmem>>, vector<1x24x128xbf16>
    %11 = vector.shape_cast %10 : vector<1x24x128xbf16> to vector<24x128xbf16>
    %cst_11 = arith.constant dense<0.000000e+00> : vector<224x128xf32>
    %12 = tpu.matmul %9, %11, %cst_11 {dimension_numbers = #tpu.dot_dimension_numbers<[1], [0], [0], [1], [0, 0, 1, 1], [], []>} : vector<224x24xbf16>, vector<24x128xbf16>, vector<224x128xf32> -> vector<224x128xf32>
    %13 = arith.addf %7, %12 : vector<224x128xf32>
    %c0_12 = arith.constant 0 : index
    %c32 = arith.constant 32 : index
    %c0_13 = arith.constant 0 : index
    %14 = vector.load %arg2[%c0_12, %c32, %c0_13] : memref<1x256x24xbf16, #tpu.memory_space<vmem>>, vector<1x224x24xbf16>
    %15 = vector.shape_cast %14 : vector<1x224x24xbf16> to vector<224x24xbf16>
    %c2 = arith.constant 2 : index
    %c0_14 = arith.constant 0 : index
    %c0_15 = arith.constant 0 : index
    %16 = vector.load %arg3[%c2, %c0_14, %c0_15] : memref<3x24x128xbf16, #tpu.memory_space<vmem>>, vector<1x24x128xbf16>
    %17 = vector.shape_cast %16 : vector<1x24x128xbf16> to vector<24x128xbf16>
    %cst_16 = arith.constant dense<0.000000e+00> : vector<224x128xf32>
    %18 = tpu.matmul %15, %17, %cst_16 {dimension_numbers = #tpu.dot_dimension_numbers<[1], [0], [0], [1], [0, 0, 1, 1], [], []>} : vector<224x24xbf16>, vector<24x128xbf16>, vector<224x128xf32> -> vector<224x128xf32>
    %19 = arith.addf %13, %18 : vector<224x128xf32>
    %cst_17 = arith.constant 0.000000e+00 : f32
    %20 = vector.broadcast %cst_17 : f32 to vector<224x128xf32>
    %21 = arith.maximumf %19, %20 : vector<224x128xf32>
    %22 = arith.truncf %21 : vector<224x128xf32> to vector<224x128xbf16>
    %c0_18 = arith.constant 0 : index
    %c0_19 = arith.constant 0 : index
    %c0_20 = arith.constant 0 : index
    %23 = vector.load %arg5[%c0_18, %c0_19, %c0_20] : memref<1x224x128xbf16, #tpu.memory_space<vmem>>, vector<1x224x128xbf16>
    %24 = vector.shape_cast %23 : vector<1x224x128xbf16> to vector<224x128xbf16>
    %25 = vector.shape_cast %22 : vector<224x128xbf16> to vector<1x224x128xbf16>
    tpu.vector_store %arg5[%c0_18, %c0_19, %c0_20], %25 {strides = array<i32>} : memref<1x224x128xbf16, #tpu.memory_space<vmem>>, vector<1x224x128xbf16>,
    return
  }
  func.func @transform_0(%arg0: i32, %arg1: i32) -> (i32, i32, i32) {
    %c0_i32 = arith.constant 0 : i32
    %c0_i32_0 = arith.constant 0 : i32
    %c0_i32_1 = arith.constant 0 : i32
    return %arg0, %c0_i32, %c0_i32_0 : i32, i32, i32
  }
  func.func @transform_1(%arg0: i32, %arg1: i32) -> (i32, i32, i32) {
    %c0_i32 = arith.constant 0 : i32
    %c0_i32_0 = arith.constant 0 : i32
    %c0_i32_1 = arith.constant 0 : i32
    return %c0_i32, %c0_i32_0, %arg1 : i32, i32, i32
  }
  func.func @transform_2(%arg0: i32, %arg1: i32) -> (i32, i32) {
    %c0_i32 = arith.constant 0 : i32
    %c0_i32_0 = arith.constant 0 : i32
    return %c0_i32, %arg1 : i32, i32
  }
  func.func @transform_3(%arg0: i32, %arg1: i32) -> (i32, i32, i32) {
    %c0_i32 = arith.constant 0 : i32
    %c0_i32_0 = arith.constant 0 : i32
    return %arg0, %c0_i32, %arg1 : i32, i32, i32
  }
}

</mosaic_0001>

<bundles_post_ra>
// kernel: basic_conv.1
= control target key start
LH: loop header
LB: loop body
LE: loop exit
PB: predicated region body
PF: predicated region fallthrough
CT: control target
= control target key end

     0   :  { %s1623_s12 = smov 0   ;;  %s1625_s13 = smov 0   ;;  %s1843_s0 = inlined_call_operand.vmem [shape: bf16[2,256,24], index: 0, kind: input, shape index: {}]   ;;  %s1844_s1 = inlined_call_operand.vmem [shape: bf16[3,24,128], index: 1, kind: input, shape index: {}]   ;;  %s1845_s2 = inlined_call_operand.vmem [shape: f32[1,128], index: 2, kind: input, shape index: {}]   ;;  %s1846_s3 = inlined_call_operand.vmem [shape: bf16[2,224,128], index: 3, kind: output, shape index: {}]  }
   0x1   :  { %s1627_s14 = smov 0  }
   0x2 LB: > { %s25_s15 = sadd.s32 1, %s1597_s13  ;;  %p1184_p0 = scmp.ge.s32.totalorder %s1601_s14, 1  ;;  %s1601_s14 = sphi %s1627_s14, %s13_s14   ;;  %s1597_s13 = sphi %s1625_s13, %s1848_s13   ;;  %s1593_s12 = sphi %s1623_s12, %s1847_s12  }
   0x3   : > { %p27_p1 = scmp.ge.s32.totalorder %s25_s15, 2  ;;  %p168_p2 = scmp.lt.s32.totalorder %s1601_s14, 3 }
   0x5   : > { %s1850_s15 = smov (%p27_p1, %s25_s15), 0  ;;  %p169_p3 = pnand %p1184_p0, %p168_p2 }
   0x6   : > { %p202_p4 = scmp.lt.s32.totalorder (!%p169_p3), %s1593_s12, 1 }
   0x7   : > { %172 = sbr.rel (%p169_p3) target bundleno = 334 (0x14e), region = 32 }
   0xc   : > { %v254_v0 = vld [vmem:[%s1844_s1 + $0x8] sm:$0xf]  ;;  %v1264_v1 = vld [vmem:[%s1844_s1 + $0x14] sm:$0xf]  ;;  %v1341_v4 = vld [vmem:[%s1844_s1 + $0x20] sm:$0xf] }
   0xd   : > { %v333_v2 = vunpack.c.l.b16 %v254_v0  ;;  %v570_v3 = vunpack.c.l.b16 %v1264_v1  ;;  %vm380_vm0 = vcmask 1043456   ;;  %v833_v5 = vunpack.c.l.b16 %v1341_v4  ;;  %s1852_s12 = smov (!%p202_p4, %s1593_s12), 1  ;;  %v1433_v12 = vld [vmem:[%s1844_s1] sm:$0xff]  ;;  %v1448_v13 = vld [vmem:[%s1844_s1 + $0xc] sm:$0xff]  ;;  %v1463_v14 = vld [vmem:[%s1844_s1 + $0x18] sm:$0xff] }
   0xe   : > { %s1418_s22 = sshll.u32 %s1852_s12, 7  ;;  %vm337_vm1 = vcmask 195584   ;;  %v1738_v53 = vld [vmem:[%s1845_s2] ss:$0 sm:$0xff]  ;;  %s1553_s7 = smul.u32 112, %s1852_s12 }
   0xf   : > { %v335_v6 = vpack.c.b16 %v333_v2, %v333_v2  ;;  %v572_v7 = vpack.c.b16 %v570_v3, %v570_v3  ;;  %v835_v8 = vpack.c.b16 %v833_v5, %v833_v5  ;;  %s1659_s27 = scalar_lea.vmem %s1843_s0, %s1418_s22 }
  0x10   : > { %v1419_v15 = vld [vmem:[%s1659_s27] sm:$0xff]  ;;  %v1430_v16 = vld [vmem:[%s1659_s27 + $0x58] sm:$0xff]  ;;  %v1434_v17 = vld [vmem:[%s1659_s27 + $0x8] sm:$0xff]  ;;  %s1757_s10 = scalar_lea.vmem %s1846_s3, %s1553_s7 }
  0x11   : > { %v382_v9 = vsel %vm380_vm0, %v335_v6, 0  ;;  %v617_v10 = vsel %vm380_vm0, %v572_v7, 0  ;;  %v880_v11 = vsel %vm380_vm0, %v835_v8, 0  ;;  %v1449_v18 = vld [vmem:[%s1659_s27 + $0x10] sm:$0xff]  ;;  %v1420_v19 = vld [vmem:[%s1659_s27 + $0x8] sm:$0xff]  ;;  %v1431_v20 = vld [vmem:[%s1659_s27 + $0x60] sm:$0xff] }
  0x12   : > { %390 = vmatpush.bf16.msra.mxu0 %v382_v9  ;;  %1547 = vmatpush.bf16.msra.mxu3 %v382_v9  ;;  %v1435_v21 = vld [vmem:[%s1659_s27 + $0x10] sm:$0xff]  ;;  %v1450_v22 = vld [vmem:[%s1659_s27 + $0x18] sm:$0xff]  ;;  %v1432_v24 = vld [vmem:[%s1659_s27 + $0x68] sm:$0xff] }
  0x13   : > { %625 = vmatpush.bf16.msra.mxu1 %v617_v10  ;;  %888 = vmatpush.bf16.msra.mxu2 %v880_v11  ;;  %v1421_v23 = vld [vmem:[%s1659_s27 + $0x10] sm:$0xff]  ;;  %v1436_v25 = vld [vmem:[%s1659_s27 + $0x18] sm:$0xff]  ;;  %v1451_v26 = vld [vmem:[%s1659_s27 + $0x20] sm:$0xff] }
  0x14   : > { %v1422_v27 = vld [vmem:[%s1659_s27 + $0x18] sm:$0xff]  ;;  %v1445_v28 = vld [vmem:[%s1659_s27 + $0x60] sm:$0xff]  ;;  %v1452_v30 = vld [vmem:[%s1659_s27 + $0x28] sm:$0xff] }
  0x15   : > { %v1437_v29 = vld [vmem:[%s1659_s27 + $0x20] sm:$0xff]  ;;  %v1446_v32 = vld [vmem:[%s1659_s27 + $0x68] sm:$0xff]  ;;  %v1453_v34 = vld [vmem:[%s1659_s27 + $0x30] sm:$0xff] }
  0x16   : > { %391 = vmatpush.bf16.msra.mxu0 %v1433_v12  ;;  %1548 = vmatpush.bf16.msra.mxu3 %v1433_v12  ;;  %v1423_v31 = vld [vmem:[%s1659_s27 + $0x20] sm:$0xff]  ;;  %v1438_v33 = vld [vmem:[%s1659_s27 + $0x28] sm:$0xff]  ;;  %v1447_v36 = vld [vmem:[%s1659_s27 + $0x70] sm:$0xff] }
  0x17   : > { %626 = vmatpush.bf16.msra.mxu1 %v1448_v13  ;;  %889 = vmatpush.bf16.msra.mxu2 %v1463_v14  ;;  %v1424_v35 = vld [vmem:[%s1659_s27 + $0x28] sm:$0xff]  ;;  %v1439_v37 = vld [vmem:[%s1659_s27 + $0x30] sm:$0xff]  ;;  %v1454_v38 = vld [vmem:[%s1659_s27 + $0x38] sm:$0xff] }
  0x18   : > { %v1425_v39 = vld [vmem:[%s1659_s27 + $0x30] sm:$0xff]  ;;  %v1460_v40 = vld [vmem:[%s1659_s27 + $0x68] sm:$0xff]  ;;  %v1440_v41 = vld [vmem:[%s1659_s27 + $0x38] sm:$0xff] }
  0x19   : > { %1248 = vmatmul.msk.bf16.vlgmr.msra.gmra.mxu0 %vm337_vm1, %v1419_v15  ;;  %1259 = vmatmul.msk.bf16.vlgmr.msra.gmra.mxu3 %vm337_vm1, %v1430_v16  ;;  %v1455_v42 = vld [vmem:[%s1659_s27 + $0x40] sm:$0xff]  ;;  %v1426_v43 = vld [vmem:[%s1659_s27 + $0x38] sm:$0xff]  ;;  %v1461_v44 = vld [vmem:[%s1659_s27 + $0x70] sm:$0xff] }
  0x1a   : > { %1549 = vmatpush.bf16.msrb.mxu3 %v617_v10  ;;  %1325 = vmatmul.msk.bf16.vlgmr.msra.gmra.mxu1 %vm337_vm1, %v1434_v17  ;;  %v1441_v45 = vld [vmem:[%s1659_s27 + $0x40] sm:$0xff]  ;;  %v1456_v46 = vld [vmem:[%s1659_s27 + $0x48] sm:$0xff]  ;;  %v1462_v48 = vld [vmem:[%s1659_s27 + $0x78] sm:$0xff] }
  0x1b   : > { %1402 = vmatmul.msk.bf16.vlgmr.msra.gmra.mxu2 %vm337_vm1, %v1449_v18  ;;  %v1427_v47 = vld [vmem:[%s1659_s27 + $0x40] sm:$0xff]  ;;  %v1442_v50 = vld [vmem:[%s1659_s27 + $0x48] sm:$0xff]  ;;  %v1457_v51 = vld [vmem:[%s1659_s27 + $0x50] sm:$0xff] }
  0x1c   : > { %v1428_v1 = vld [vmem:[%s1659_s27 + $0x48] sm:$0xff]  ;;  %v1443_v4 = vld [vmem:[%s1659_s27 + $0x50] sm:$0xff]  ;;  %v1458_v5 = vld [vmem:[%s1659_s27 + $0x58] sm:$0xff] }
  0x1e   : > { %1550 = vmatpush.bf16.msrb.mxu3 %v1448_v13 }
  0x22   : > { %1551 = vmatpush.bf16.msra.mxu3 %v880_v11 }
  0x26   : > { %1552 = vmatpush.bf16.msra.mxu3 %v1463_v14 }
  0x29   : > { %1249 = vmatmul.msk.bf16.gmra.mxu0 %vm337_vm1, %v1420_v19  ;;  %1260 = vmatmul.msk.bf16.gmra.mxu3 %vm337_vm1, %v1431_v20 }
  0x2a   : > { %1326 = vmatmul.msk.bf16.gmra.mxu1 %vm337_vm1, %v1435_v21  ;;  %v1429_v21 = vld [vmem:[%s1659_s27 + $0x50] sm:$0xff] }
  0x2b   : > { %1403 = vmatmul.msk.bf16.gmra.mxu2 %vm337_vm1, %v1450_v22 }
  0x39   : > { %1250 = vmatmul.msk.bf16.gmra.mxu0 %vm337_vm1, %v1421_v23  ;;  %1261 = vmatmul.msk.bf16.gmra.mxu3 %vm337_vm1, %v1432_v24  ;;  %v1444_v24 = vld [vmem:[%s1659_s27 + $0x58] sm:$0xff] }
  0x3a   : > { %1327 = vmatmul.msk.bf16.gmra.mxu1 %vm337_vm1, %v1436_v25  ;;  %v1459_v25 = vld [vmem:[%s1659_s27 + $0x60] sm:$0xff] }
  0x3b   : > { %1404 = vmatmul.msk.bf16.gmra.mxu2 %vm337_vm1, %v1451_v26 }
  0x49   : > { %1251 = vmatmul.msk.bf16.gmra.mxu0 %vm337_vm1, %v1422_v27  ;;  %1336 = vmatmul.msk.bf16.vlgmr.msrb.gmra.mxu3 %vm337_vm1, %v1445_v28 }
  0x4a   : > { %1328 = vmatmul.msk.bf16.gmra.mxu1 %vm337_vm1, %v1437_v29 }
  0x4b   : > { %1405 = vmatmul.msk.bf16.gmra.mxu2 %vm337_vm1, %v1452_v30 }
  0x59   : > { %1252 = vmatmul.msk.bf16.gmra.mxu0 %vm337_vm1, %v1423_v31  ;;  %1337 = vmatmul.msk.bf16.gmra.mxu3 %vm337_vm1, %v1446_v32 }
  0x5a   : > { %1329 = vmatmul.msk.bf16.gmra.mxu1 %vm337_vm1, %v1438_v33 }
  0x5b   : > { %1406 = vmatmul.msk.bf16.gmra.mxu2 %vm337_vm1, %v1453_v34 }
  0x69   : > { %1253 = vmatmul.msk.bf16.gmra.mxu0 %vm337_vm1, %v1424_v35  ;;  %1338 = vmatmul.msk.bf16.gmra.mxu3 %vm337_vm1, %v1447_v36 }
  0x6a   : > { %1330 = vmatmul.msk.bf16.gmra.mxu1 %vm337_vm1, %v1439_v37 }
  0x6b   : > { %1407 = vmatmul.msk.bf16.gmra.mxu2 %vm337_vm1, %v1454_v38 }
  0x79   : > { %1254 = vmatmul.msk.bf16.gmra.mxu0 %vm337_vm1, %v1425_v39  ;;  %1413 = vmatmul.msk.bf16.vlgmr.msra.gmra.mxu3 %vm337_vm1, %v1460_v40 }
  0x7a   : > { %1331 = vmatmul.msk.bf16.gmra.mxu1 %vm337_vm1, %v1440_v41 }
  0x7b   : > { %1408 = vmatmul.msk.bf16.gmra.mxu2 %vm337_vm1, %v1455_v42 }
  0x89   : > { %1255 = vmatmul.msk.bf16.gmra.mxu0 %vm337_vm1, %v1426_v43  ;;  %1414 = vmatmul.msk.bf16.gmra.mxu3 %vm337_vm1, %v1461_v44 }
  0x8a   : > { %1332 = vmatmul.msk.bf16.gmra.mxu1 %vm337_vm1, %v1441_v45 }
  0x8b   : > { %1409 = vmatmul.msk.bf16.gmra.mxu2 %vm337_vm1, %v1456_v46 }
  0x96   : > { %v393_v49 = vpop.f32.mrf.mxu0 }
  0x97   : > { %v628_v52 = vpop.f32.mrf.mxu1  ;;  %v394_v54 = vadd.f32 %v1738_v53, %v393_v49 }
  0x99   : > { %1256 = vmatmul.msk.bf16.gmra.mxu0 %vm337_vm1, %v1427_v47  ;;  %1415 = vmatmul.msk.bf16.gmra.mxu3 %vm337_vm1, %v1462_v48  ;;  %v698_v59 = vadd.f32 %v628_v52, %v394_v54 }
  0x9a   : > { %1333 = vmatmul.msk.bf16.gmra.mxu1 %vm337_vm1, %v1442_v50 }
  0x9b   : > { %1410 = vmatmul.msk.bf16.gmra.mxu2 %vm337_vm1, %v1457_v51 }
  0x9c   : > { %v1745_v55 = vpop.f32.mrf.mxu3 }
  0x9e   : > { %v891_v56 = vpop.f32.mrf.mxu2  ;;  %v395_v57 = vpop.f32.mrf.mxu0 }
  0x9f   : > { %v630_v58 = vpop.f32.mrf.mxu1  ;;  %v396_v60 = vadd.f32 %v1738_v53, %v395_v57  ;;  %v961_v61 = vadd.f32 %v891_v56, %v698_v59 }
  0xa1   : > { %v699_v62 = vadd.f32 %v630_v58, %v396_v60  ;;  %v989_v7 = vmax.f32 %v961_v61, 0.0 }
  0xa4   : > { %v1748_v63 = vpop.f32.mrf.mxu3 }
  0xa6   : > { %v893_v0 = vpop.f32.mrf.mxu2  ;;  %v398_v3 = vpop.f32.mrf.mxu0 }
  0xa7   : > { %v962_v2 = vadd.f32 %v893_v0, %v699_v62  ;;  %v633_v6 = vpop.f32.mrf.mxu1  ;;  %v399_v10 = vadd.f32 %v1738_v53, %v398_v3 }
  0xa9   : > { %v990_v8 = vmax.f32 %v962_v2, 0.0  ;;  %1257 = vmatmul.msk.bf16.gmra.mxu0 %vm337_vm1, %v1428_v1  ;;  %v700_v15 = vadd.f32 %v633_v6, %v399_v10 }
  0xaa   : > { %1334 = vmatmul.msk.bf16.gmra.mxu1 %vm337_vm1, %v1443_v4 }
  0xab   : > { %v1467_v9 = vpack.c.bf16 %v990_v8, %v989_v7  ;;  %1411 = vmatmul.msk.bf16.gmra.mxu2 %vm337_vm1, %v1458_v5 }
  0xac   : > { %v1764_v11 = vpop.f32.mrf.mxu3 }
  0xad   : > { %1468 = vst [vmem:[%s1757_s10] sm:$0xff] %v1467_v9  }
  0xae   : > { %v896_v12 = vpop.f32.mrf.mxu2  ;;  %v400_v13 = vpop.f32.mrf.mxu0 }
  0xaf   : > { %v635_v14 = vpop.f32.mrf.mxu1  ;;  %v401_v16 = vadd.f32 %v1738_v53, %v400_v13  ;;  %v963_v17 = vadd.f32 %v896_v12, %v700_v15 }
  0xb1   : > { %v701_v18 = vadd.f32 %v635_v14, %v401_v16  ;;  %v991_v27 = vmax.f32 %v963_v17, 0.0 }
  0xb4   : > { %v1767_v19 = vpop.f32.mrf.mxu3 }
  0xb6   : > { %v898_v20 = vpop.f32.mrf.mxu2  ;;  %v403_v23 = vpop.f32.mrf.mxu0 }
  0xb7   : > { %v964_v22 = vadd.f32 %v898_v20, %v701_v18  ;;  %v638_v26 = vpop.f32.mrf.mxu1  ;;  %v404_v30 = vadd.f32 %v1738_v53, %v403_v23 }
  0xb9   : > { %v992_v28 = vmax.f32 %v964_v22, 0.0  ;;  %1258 = vmatmul.msk.bf16.gmra.mxu0 %vm337_vm1, %v1429_v21  ;;  %v702_v35 = vadd.f32 %v638_v26, %v404_v30 }
  0xba   : > { %1335 = vmatmul.msk.bf16.gmra.mxu1 %vm337_vm1, %v1444_v24 }
  0xbb   : > { %v1472_v29 = vpack.c.bf16 %v992_v28, %v991_v27  ;;  %1412 = vmatmul.msk.bf16.gmra.mxu2 %vm337_vm1, %v1459_v25 }
  0xbc   : > { %v1777_v31 = vpop.f32.mrf.mxu3 }
  0xbd   : > { %1534 = vst [vmem:[%s1757_s10 + $0x8] sm:$0xff] %v1472_v29  }
  0xbe   : > { %v901_v32 = vpop.f32.mrf.mxu2  ;;  %v405_v33 = vpop.f32.mrf.mxu0 }
  0xbf   : > { %v640_v34 = vpop.f32.mrf.mxu1  ;;  %v406_v36 = vadd.f32 %v1738_v53, %v405_v33  ;;  %v965_v37 = vadd.f32 %v901_v32, %v702_v35 }
  0xc1   : > { %v703_v38 = vadd.f32 %v640_v34, %v406_v36  ;;  %v993_v44 = vmax.f32 %v965_v37, 0.0 }
  0xc4   : > { %v1780_v39 = vpop.f32.mrf.mxu3 }
  0xc6   : > { %v903_v40 = vpop.f32.mrf.mxu2  ;;  %v408_v42 = vpop.f32.mrf.mxu0 }
  0xc7   : > { %v966_v41 = vadd.f32 %v903_v40, %v703_v38  ;;  %v643_v43 = vpop.f32.mrf.mxu1  ;;  %v409_v47 = vadd.f32 %v1738_v53, %v408_v42 }
  0xc9   : > { %v994_v45 = vmax.f32 %v966_v41, 0.0  ;;  %v704_v52 = vadd.f32 %v643_v43, %v409_v47 }
  0xcb   : > { %v1477_v46 = vpack.c.bf16 %v994_v45, %v993_v44  ;;  %v449_v45 = vadd.f32 %v1738_v53, %v1745_v55 }
  0xcc   : > { %v683_v48 = vpop.f32.mrf.mxu3 }
  0xcd   : > { %1535 = vst [vmem:[%s1757_s10 + $0x10] sm:$0xff] %v1477_v46  }
  0xce   : > { %v906_v49 = vpop.f32.mrf.mxu2  ;;  %v410_v50 = vpop.f32.mrf.mxu0 }
  0xcf   : > { %v645_v51 = vpop.f32.mrf.mxu1  ;;  %v411_v54 = vadd.f32 %v1738_v53, %v410_v50  ;;  %v967_v56 = vadd.f32 %v906_v49, %v704_v52  ;;  %v451_v50 = vadd.f32 %v1738_v53, %v1748_v63 }
  0xd1   : > { %v705_v57 = vadd.f32 %v645_v51, %v411_v54  ;;  %v995_v0 = vmax.f32 %v967_v56, 0.0  ;;  %v720_v51 = vadd.f32 %v683_v48, %v449_v45 }
  0xd4   : > { %v685_v58 = vpop.f32.mrf.mxu3 }
  0xd5   : > { %v721_v52 = vadd.f32 %v685_v58, %v451_v50 }
  0xd6   : > { %v908_v59 = vpop.f32.mrf.mxu2  ;;  %v413_v61 = vpop.f32.mrf.mxu0 }
  0xd7   : > { %v968_v60 = vadd.f32 %v908_v59, %v705_v57  ;;  %v648_v62 = vpop.f32.mrf.mxu1  ;;  %v414_v3 = vadd.f32 %v1738_v53, %v413_v61 }
  0xd9   : > { %v996_v1 = vmax.f32 %v968_v60, 0.0  ;;  %v706_v8 = vadd.f32 %v648_v62, %v414_v3 }
  0xdb   : > { %v1482_v2 = vpack.c.bf16 %v996_v1, %v995_v0 }
  0xdc   : > { %v1787_v4 = vpop.f32.mrf.mxu3 }
  0xdd   : > { %1536 = vst [vmem:[%s1757_s10 + $0x18] sm:$0xff] %v1482_v2  }
  0xde   : > { %v911_v5 = vpop.f32.mrf.mxu2  ;;  %v415_v6 = vpop.f32.mrf.mxu0 }
  0xdf   : > { %v650_v7 = vpop.f32.mrf.mxu1  ;;  %v416_v9 = vadd.f32 %v1738_v53, %v415_v6  ;;  %v969_v10 = vadd.f32 %v911_v5, %v706_v8 }
  0xe1   : > { %v707_v12 = vadd.f32 %v650_v7, %v416_v9  ;;  %v997_v18 = vmax.f32 %v969_v10, 0.0  ;;  %v454_v9 = vadd.f32 %v1738_v53, %v1764_v11 }
  0xe4   : > { %v1790_v13 = vpop.f32.mrf.mxu3 }
  0xe6   : > { %v913_v14 = vpop.f32.mrf.mxu2  ;;  %v418_v16 = vpop.f32.mrf.mxu0 }
  0xe7   : > { %v970_v15 = vadd.f32 %v913_v14, %v707_v12  ;;  %v653_v17 = vpop.f32.mrf.mxu1  ;;  %v419_v22 = vadd.f32 %v1738_v53, %v418_v16  ;;  %v722_v16 = vadd.f32 %v1787_v4, %v454_v9 }
  0xe9   : > { %v998_v20 = vmax.f32 %v970_v15, 0.0  ;;  %v708_v27 = vadd.f32 %v653_v17, %v419_v22  ;;  %v456_v15 = vadd.f32 %v1738_v53, %v1767_v19 }
  0xeb   : > { %v1487_v21 = vpack.c.bf16 %v998_v20, %v997_v18  ;;  %v723_v17 = vadd.f32 %v1790_v13, %v456_v15 }
  0xec   : > { %v1794_v23 = vpop.f32.mrf.mxu3 }
  0xed   : > { %1537 = vst [vmem:[%s1757_s10 + $0x20] sm:$0xff] %v1487_v21  }
  0xee   : > { %v916_v24 = vpop.f32.mrf.mxu2  ;;  %v420_v25 = vpop.f32.mrf.mxu0 }
  0xef   : > { %v655_v26 = vpop.f32.mrf.mxu1  ;;  %v421_v28 = vadd.f32 %v1738_v53, %v420_v25  ;;  %v971_v29 = vadd.f32 %v916_v24, %v708_v27 }
  0xf1   : > { %v709_v30 = vadd.f32 %v655_v26, %v421_v28  ;;  %v999_v37 = vmax.f32 %v971_v29, 0.0 }
  0xf4   : > { %v1797_v32 = vpop.f32.mrf.mxu3 }
  0xf6   : > { %v918_v33 = vpop.f32.mrf.mxu2  ;;  %v423_v35 = vpop.f32.mrf.mxu0 }
  0xf7   : > { %v972_v34 = vadd.f32 %v918_v33, %v709_v30  ;;  %v658_v36 = vpop.f32.mrf.mxu1  ;;  %v424_v41 = vadd.f32 %v1738_v53, %v423_v35 }
  0xf9   : > { %v1000_v38 = vmax.f32 %v972_v34, 0.0  ;;  %v710_v47 = vadd.f32 %v658_v36, %v424_v41 }
  0xfb   : > { %v1492_v40 = vpack.c.bf16 %v1000_v38, %v999_v37  ;;  %v459_v37 = vadd.f32 %v1738_v53, %v1777_v31 }
  0xfc   : > { %v946_v42 = vpop.f32.mrf.mxu3 }
  0xfd   : > { %1538 = vst [vmem:[%s1757_s10 + $0x28] sm:$0xff] %v1492_v40   ;;  %v983_v54 = vadd.f32 %v946_v42, %v720_v51  ;;  %v461_v42 = vadd.f32 %v1738_v53, %v1780_v39 }
  0xfe   : > { %v921_v43 = vpop.f32.mrf.mxu2  ;;  %v425_v44 = vpop.f32.mrf.mxu0 }
  0xff   : > { %v660_v46 = vpop.f32.mrf.mxu1  ;;  %v426_v49 = vadd.f32 %v1738_v53, %v425_v44  ;;  %v973_v56 = vadd.f32 %v921_v43, %v710_v47  ;;  %v1011_v55 = vmax.f32 %v983_v54, 0.0  ;;  %v724_v43 = vadd.f32 %v1794_v23, %v459_v37 }
 0x100   : > { %v725_v44 = vadd.f32 %v1797_v32, %v461_v42 }
 0x101   : > { %v711_v57 = vadd.f32 %v660_v46, %v426_v49  ;;  %v1001_v3 = vmax.f32 %v973_v56, 0.0 }
 0x104   : > { %v948_v59 = vpop.f32.mrf.mxu3 }
 0x105   : > { %v984_v61 = vadd.f32 %v948_v59, %v721_v52 }
 0x106   : > { %v923_v60 = vpop.f32.mrf.mxu2  ;;  %v428_v0 = vpop.f32.mrf.mxu0 }
 0x107   : > { %v974_v62 = vadd.f32 %v923_v60, %v711_v57  ;;  %v1012_v1 = vmax.f32 %v984_v61, 0.0  ;;  %v663_v2 = vpop.f32.mrf.mxu1  ;;  %v429_v63 = vadd.f32 %v1738_v53, %v428_v0 }
 0x109   : > { %v1002_v5 = vmax.f32 %v974_v62, 0.0  ;;  %v1522_v6 = vpack.c.bf16 %v1012_v1, %v1011_v55  ;;  %v712_v12 = vadd.f32 %v663_v2, %v429_v63 }
 0x10b   : > { %v1497_v7 = vpack.c.bf16 %v1002_v5, %v1001_v3  ;;  %1544 = vst [vmem:[%s1757_s10 + $0x58] sm:$0xff] %v1522_v6  }
 0x10c   : > { %v951_v48 = vpop.f32.mrf.mxu3 }
 0x10d   : > { %1539 = vst [vmem:[%s1757_s10 + $0x30] sm:$0xff] %v1497_v7   ;;  %v985_v18 = vadd.f32 %v951_v48, %v722_v16 }
 0x10e   : > { %v926_v58 = vpop.f32.mrf.mxu2  ;;  %v430_v8 = vpop.f32.mrf.mxu0 }
 0x10f   : > { %v665_v10 = vpop.f32.mrf.mxu1  ;;  %v431_v14 = vadd.f32 %v1738_v53, %v430_v8  ;;  %v975_v20 = vadd.f32 %v926_v58, %v712_v12  ;;  %v1013_v27 = vmax.f32 %v985_v18, 0.0 }
 0x111   : > { %v713_v21 = vadd.f32 %v665_v10, %v431_v14  ;;  %v1003_v30 = vmax.f32 %v975_v20, 0.0 }
 0x114   : > { %v953_v22 = vpop.f32.mrf.mxu3 }
 0x115   : > { %v986_v25 = vadd.f32 %v953_v22, %v723_v17 }
 0x116   : > { %v928_v24 = vpop.f32.mrf.mxu2  ;;  %v433_v26 = vpop.f32.mrf.mxu0 }
 0x117   : > { %v976_v11 = vadd.f32 %v928_v24, %v713_v21  ;;  %v1014_v28 = vmax.f32 %v986_v25, 0.0  ;;  %v668_v29 = vpop.f32.mrf.mxu1  ;;  %v434_v4 = vadd.f32 %v1738_v53, %v433_v26 }
 0x119   : > { %v1004_v33 = vmax.f32 %v976_v11, 0.0  ;;  %v1527_v19 = vpack.c.bf16 %v1014_v28, %v1013_v27  ;;  %v714_v40 = vadd.f32 %v668_v29, %v434_v4 }
 0x11b   : > { %v1502_v34 = vpack.c.bf16 %v1004_v33, %v1003_v30  ;;  %1545 = vst [vmem:[%s1757_s10 + $0x60] sm:$0xff] %v1527_v19  }
 0x11c   : > { %v956_v13 = vpop.f32.mrf.mxu3 }
 0x11d   : > { %1540 = vst [vmem:[%s1757_s10 + $0x38] sm:$0xff] %v1502_v34   ;;  %v987_v45 = vadd.f32 %v956_v13, %v724_v43 }
 0x11e   : > { %v931_v35 = vpop.f32.mrf.mxu2  ;;  %v435_v36 = vpop.f32.mrf.mxu0 }
 0x11f   : > { %v670_v38 = vpop.f32.mrf.mxu1  ;;  %v436_v41 = vadd.f32 %v1738_v53, %v435_v36  ;;  %v977_v46 = vadd.f32 %v931_v35, %v714_v40  ;;  %v1015_v54 = vmax.f32 %v987_v45, 0.0 }
 0x121   : > { %v715_v47 = vadd.f32 %v670_v38, %v436_v41  ;;  %v1005_v59 = vmax.f32 %v977_v46, 0.0 }
 0x124   : > { %v958_v49 = vpop.f32.mrf.mxu3 }
 0x125   : > { %v988_v51 = vadd.f32 %v958_v49, %v725_v44 }
 0x126   : > { %v933_v50 = vpop.f32.mrf.mxu2  ;;  %v438_v52 = vpop.f32.mrf.mxu0 }
 0x127   : > { %v978_v31 = vadd.f32 %v933_v50, %v715_v47  ;;  %v1016_v56 = vmax.f32 %v988_v51, 0.0  ;;  %v673_v57 = vpop.f32.mrf.mxu1  ;;  %v439_v23 = vadd.f32 %v1738_v53, %v438_v52 }
 0x129   : > { %v1006_v60 = vmax.f32 %v978_v31, 0.0  ;;  %v1532_v39 = vpack.c.bf16 %v1016_v56, %v1015_v54  ;;  %v716_v55 = vadd.f32 %v673_v57, %v439_v23 }
 0x12b   : > { %v1507_v61 = vpack.c.bf16 %v1006_v60, %v1005_v59  ;;  %1546 = vst [vmem:[%s1757_s10 + $0x68] sm:$0xff] %v1532_v39  }
 0x12d   : > { %1541 = vst [vmem:[%s1757_s10 + $0x40] sm:$0xff] %v1507_v61  }
 0x12e   : > { %v936_v32 = vpop.f32.mrf.mxu2  ;;  %v440_v62 = vpop.f32.mrf.mxu0 }
 0x12f   : > { %v675_v0 = vpop.f32.mrf.mxu1  ;;  %v441_v1 = vadd.f32 %v1738_v53, %v440_v62  ;;  %v979_v2 = vadd.f32 %v936_v32, %v716_v55 }
 0x131   : > { %v717_v3 = vadd.f32 %v675_v0, %v441_v1  ;;  %v1007_v63 = vmax.f32 %v979_v2, 0.0 }
 0x136   : > { %v938_v5 = vpop.f32.mrf.mxu2  ;;  %v443_v7 = vpop.f32.mrf.mxu0 }
 0x137   : > { %v980_v6 = vadd.f32 %v938_v5, %v717_v3  ;;  %v678_v58 = vpop.f32.mrf.mxu1  ;;  %v444_v9 = vadd.f32 %v1738_v53, %v443_v7 }
 0x139   : > { %v1008_v48 = vmax.f32 %v980_v6, 0.0  ;;  %v718_v14 = vadd.f32 %v678_v58, %v444_v9 }
 0x13b   : > { %v1512_v8 = vpack.c.bf16 %v1008_v48, %v1007_v63 }
 0x13d   : > { %1542 = vst [vmem:[%s1757_s10 + $0x48] sm:$0xff] %v1512_v8  }
 0x13e   : > { %v941_v10 = vpop.f32.mrf.mxu2  ;;  %v445_v12 = vpop.f32.mrf.mxu0 }
 0x13f   : > { %v446_v15 = vadd.f32 %v1738_v53, %v445_v12  ;;  %v680_v16 = vpop.f32.mrf.mxu1  ;;  %v981_v17 = vadd.f32 %v941_v10, %v718_v14 }
 0x141   : > { %v719_v18 = vadd.f32 %v680_v16, %v446_v15  ;;  %v1009_v22 = vmax.f32 %v981_v17, 0.0 }
 0x146   : > { %v943_v20 = vpop.f32.mrf.mxu2 }
 0x147   : > { %v982_v21 = vadd.f32 %v943_v20, %v719_v18 }
 0x149   : > { %v1010_v24 = vmax.f32 %v982_v21, 0.0 }
 0x14b   : > { %v1517_v25 = vpack.c.bf16 %v1010_v24, %v1009_v22 }
 0x14d   : > { %1543 = vst [vmem:[%s1757_s10 + $0x50] sm:$0xff] %v1517_v25  }
 0x14e PF: > { %s13_s14 = sadd.s32 1, %s1601_s14   ;;  %s1847_s12 = smov %s1597_s13 }
 0x14f   : > { %p10_p5 = scmp.ge.s32.totalorder %s13_s14, 4   ;;  %s1848_s13 = smov %s1850_s15 }
 0x151   :  { %12 = sbr.rel (!%p10_p5) target bundleno = 2 (0x2), region = 70 }

</bundles_post_ra>
